<compile_context>
chip_gen: v7x
topology: tpu7x:2x2x1
jax: 0.10.0
libtpu: 0.0.40
codegen_flags: <defaults>
</compile_context>

<pallas_src>
import jax
import jax.numpy as jnp
from jax.experimental import pallas as pl
from jax.experimental.pallas import tpu as pltpu

OUT_DIM = 128   # input feature dim
DIM1 = 24       # fc1 output dim
DIM2 = 8        # fc2 output dim
PACK = DIM1 + DIM2  # packed output width (32 lanes)


def _round_up(n, m):
    return ((n + m - 1) // m) * m


def _imgclsnet_kernel(x_ref, w1_ref, b1_ref, w2_ref, b2_ref, out_ref):
    # out1 = fc1(dropout(relu(x)))  -- dropout == identity (eval mode)
    x = jnp.maximum(x_ref[...], 0.0)
    out1 = jnp.dot(x, w1_ref[...], preferred_element_type=jnp.float32) + b1_ref[...]

    # out2 = fc2(dropout(relu(out1)))
    h = jnp.maximum(out1, 0.0)
    out2 = jnp.dot(h, w2_ref[...], preferred_element_type=jnp.float32) + b2_ref[...]

    # Single lane-packed store: [out1 | out2] -> (tile_b, 32)
    out_ref[...] = jnp.concatenate([out1, out2], axis=-1).astype(out_ref.dtype)


def imgclsnet_forward(x, w1_t, b1, w2_t, b2, *, tile_b=4096):
    """x: [B, 128] f32; w1_t: [128, 24]; b1: [1, 24]; w2_t: [24, 8]; b2: [1, 8].

    Returns (out1 [B, 24], out2 [B, 8]) exactly as the PyTorch module does.
    """
    B = x.shape[0]

    # Tile size: multiple of 8 (sublane constraint), no bigger than padded batch.
    tb = max(8, min(tile_b, _round_up(B, 8)))
    Bp = _round_up(B, tb)
    if Bp != B:
        x = jnp.pad(x, ((0, Bp - B), (0, 0)))
    grid = (Bp // tb,)

    packed = pl.pallas_call(
        _imgclsnet_kernel,
        out_shape=jax.ShapeDtypeStruct((Bp, PACK), jnp.float32),
        grid=grid,
        in_specs=[
            # x: tiled over batch, auto-pipelined (double-buffered).
            pl.BlockSpec((tb, OUT_DIM), lambda i: (i, 0)),
            # weights / biases: constant index_map -> resident in VMEM.
            pl.BlockSpec((OUT_DIM, DIM1), lambda i: (0, 0)),
            pl.BlockSpec((1, DIM1), lambda i: (0, 0)),
            pl.BlockSpec((DIM1, DIM2), lambda i: (0, 0)),
            pl.BlockSpec((1, DIM2), lambda i: (0, 0)),
        ],
        out_specs=pl.BlockSpec((tb, PACK), lambda i: (i, 0)),
        compiler_params=pltpu.CompilerParams(
            dimension_semantics=("parallel",)),
        cost_estimate=pl.CostEstimate(
            flops=2 * Bp * (OUT_DIM * DIM1 + DIM1 * DIM2),
            transcendentals=0,
            bytes_accessed=Bp * (OUT_DIM + PACK) * 4
            + (OUT_DIM * DIM1 + DIM1 + DIM1 * DIM2 + DIM2) * 4,
        ),
    )(x, w1_t, b1, w2_t, b2)

    out1 = packed[:B, :DIM1]
    out2 = packed[:B, DIM1:]
    return out1, out2


def init_params(key):
    """Deterministic synthetic params; shapes match nn.Linear(128,24), nn.Linear(24,8)."""
    k1, k2, k3, k4 = jax.random.split(key, 4)
    # PyTorch Linear stores W as [out, in]; we keep the transposed [in, out] layout
    # so the kernel computes y = x @ W_t + b == x @ W.T + b.
    bound1 = 1.0 / jnp.sqrt(OUT_DIM)
    bound2 = 1.0 / jnp.sqrt(DIM1)
    w1_t = jax.random.uniform(k1, (OUT_DIM, DIM1), jnp.float32, -bound1, bound1)
    b1 = jax.random.uniform(k2, (1, DIM1), jnp.float32, -bound1, bound1)
    w2_t = jax.random.uniform(k3, (DIM1, DIM2), jnp.float32, -bound2, bound2)
    b2 = jax.random.uniform(k4, (1, DIM2), jnp.float32, -bound2, bound2)
    return w1_t, b1, w2_t, b2


if __name__ == "__main__":
    key = jax.random.PRNGKey(0)
    kx, kp = jax.random.split(key)

    B = 2
    x = jax.random.normal(kx, (B, OUT_DIM), jnp.float32)
    w1_t, b1, w2_t, b2 = init_params(kp)

    out1, out2 = imgclsnet_forward(x, w1_t, b1, w2_t, b2)
    out1, out2 = jax.block_until_ready((out1, out2))

    # Reference check (pure JAX, eval-mode dropout == identity):
    #   out1 = relu(x) @ W1_t + b1 ; out2 = relu(out1) @ W2_t + b2
    ref1 = jnp.maximum(x, 0.0) @ w1_t + b1
    ref2 = jnp.maximum(ref1, 0.0) @ w2_t + b2
    assert out1.shape == (B, DIM1) and out2.shape == (B, DIM2)
    assert jnp.allclose(out1, ref1, atol=1e-5)
    assert jnp.allclose(out2, ref2, atol=1e-5)

    # Also exercise the multi-tile (grid > 1) path with a batch that is not a
    # multiple of the tile size, using a small tile to force several grid steps.
    B2 = 100
    x_big = jax.random.normal(kx, (B2, OUT_DIM), jnp.float32)
    o1b, o2b = imgclsnet_forward(x_big, w1_t, b1, w2_t, b2, tile_b=32)
    o1b, o2b = jax.block_until_ready((o1b, o2b))
    r1b = jnp.maximum(x_big, 0.0) @ w1_t + b1
    r2b = jnp.maximum(r1b, 0.0) @ w2_t + b2
    assert jnp.allclose(o1b, r1b, atol=1e-5)
    assert jnp.allclose(o2b, r2b, atol=1e-5)

    print("KERNEL_OK")
</pallas_src>

<mosaic_0001>
module attributes {stable_mosaic.version = 11 : i64} {
  func.func @_imgclsnet_kernel(%arg0: i32, %arg1: memref<8x128xf32, #tpu.memory_space<vmem>>, %arg2: memref<128x24xf32, #tpu.memory_space<vmem>>, %arg3: memref<1x24xf32, #tpu.memory_space<vmem>>, %arg4: memref<24x8xf32, #tpu.memory_space<vmem>>, %arg5: memref<1x8xf32, #tpu.memory_space<vmem>>, %arg6: memref<8x32xf32, #tpu.memory_space<vmem>>) attributes {dimension_semantics = [#tpu.dimension_semantics<parallel>], iteration_bounds = array<i64: 1>, scalar_prefetch = 0 : i64, scratch_operands = 0 : i64, tpu.core_type = #tpu.core_type<tc>, window_params = [{transform_indices = @transform_0, window_bounds = array<i64: 8, 128>}, {pipeline_mode = #tpu.pipeline_mode<synchronous>, transform_indices = @transform_1, window_bounds = array<i64: 128, 24>}, {pipeline_mode = #tpu.pipeline_mode<synchronous>, transform_indices = @transform_2, window_bounds = array<i64: 1, 24>}, {pipeline_mode = #tpu.pipeline_mode<synchronous>, transform_indices = @transform_3, window_bounds = array<i64: 24, 8>}, {pipeline_mode = #tpu.pipeline_mode<synchronous>, transform_indices = @transform_4, window_bounds = array<i64: 1, 8>}, {transform_indices = @transform_5, window_bounds = array<i64: 8, 32>}]} {
    %c0 = arith.constant 0 : index
    %c0_0 = arith.constant 0 : index
    %0 = vector.load %arg1[%c0, %c0_0] : memref<8x128xf32, #tpu.memory_space<vmem>>, vector<8x128xf32>
    %cst = arith.constant 0.000000e+00 : f32
    %1 = vector.broadcast %cst : f32 to vector<8x128xf32>
    %2 = arith.maximumf %0, %1 : vector<8x128xf32>
    %c0_1 = arith.constant 0 : index
    %c0_2 = arith.constant 0 : index
    %3 = vector.load %arg2[%c0_1, %c0_2] : memref<128x24xf32, #tpu.memory_space<vmem>>, vector<128x24xf32>
    %cst_3 = arith.constant dense<0.000000e+00> : vector<8x24xf32>
    %4 = tpu.matmul %2, %3, %cst_3 {dimension_numbers = #tpu.dot_dimension_numbers<[1], [0], [0], [1], [0, 0, 1, 1], [], []>} : vector<8x128xf32>, vector<128x24xf32>, vector<8x24xf32> -> vector<8x24xf32>
    %c0_4 = arith.constant 0 : index
    %c0_5 = arith.constant 0 : index
    %5 = vector.load %arg3[%c0_4, %c0_5] : memref<1x24xf32, #tpu.memory_space<vmem>>, vector<1x24xf32>
    %6 = vector.broadcast %5 : vector<1x24xf32> to vector<8x24xf32>
    %7 = arith.addf %4, %6 : vector<8x24xf32>
    %cst_6 = arith.constant 0.000000e+00 : f32
    %8 = vector.broadcast %cst_6 : f32 to vector<8x24xf32>
    %9 = arith.maximumf %7, %8 : vector<8x24xf32>
    %c0_7 = arith.constant 0 : index
    %c0_8 = arith.constant 0 : index
    %10 = vector.load %arg4[%c0_7, %c0_8] : memref<24x8xf32, #tpu.memory_space<vmem>>, vector<24x8xf32>
    %cst_9 = arith.constant dense<0.000000e+00> : vector<8x8xf32>
    %11 = tpu.matmul %9, %10, %cst_9 {dimension_numbers = #tpu.dot_dimension_numbers<[1], [0], [0], [1], [0, 0, 1, 1], [], []>} : vector<8x24xf32>, vector<24x8xf32>, vector<8x8xf32> -> vector<8x8xf32>
    %c0_10 = arith.constant 0 : index
    %c0_11 = arith.constant 0 : index
    %12 = vector.load %arg5[%c0_10, %c0_11] : memref<1x8xf32, #tpu.memory_space<vmem>>, vector<1x8xf32>
    %13 = vector.broadcast %12 : vector<1x8xf32> to vector<8x8xf32>
    %14 = arith.addf %11, %13 : vector<8x8xf32>
    %15 = tpu.concatenate %7, %14 in 1 : vector<8x24xf32>, vector<8x8xf32> -> vector<8x32xf32>
    %c0_12 = arith.constant 0 : index
    %c0_13 = arith.constant 0 : index
    %16 = vector.load %arg6[%c0_12, %c0_13] : memref<8x32xf32, #tpu.memory_space<vmem>>, vector<8x32xf32>
    tpu.vector_store %arg6[%c0_12, %c0_13], %15 {strides = array<i32>} : memref<8x32xf32, #tpu.memory_space<vmem>>, vector<8x32xf32>,
    return
  }
  func.func @transform_0(%arg0: i32) -> (i32, i32) {
    %c0_i32 = arith.constant 0 : i32
    %c0_i32_0 = arith.constant 0 : i32
    return %arg0, %c0_i32 : i32, i32
  }
  func.func @transform_1(%arg0: i32) -> (i32, i32) {
    %c0_i32 = arith.constant 0 : i32
    %c0_i32_0 = arith.constant 0 : i32
    %c0_i32_1 = arith.constant 0 : i32
    return %c0_i32, %c0_i32_0 : i32, i32
  }
  func.func @transform_2(%arg0: i32) -> (i32, i32) {
    %c0_i32 = arith.constant 0 : i32
    %c0_i32_0 = arith.constant 0 : i32
    %c0_i32_1 = arith.constant 0 : i32
    return %c0_i32, %c0_i32_0 : i32, i32
  }
  func.func @transform_3(%arg0: i32) -> (i32, i32) {
    %c0_i32 = arith.constant 0 : i32
    %c0_i32_0 = arith.constant 0 : i32
    %c0_i32_1 = arith.constant 0 : i32
    return %c0_i32, %c0_i32_0 : i32, i32
  }
  func.func @transform_4(%arg0: i32) -> (i32, i32) {
    %c0_i32 = arith.constant 0 : i32
    %c0_i32_0 = arith.constant 0 : i32
    %c0_i32_1 = arith.constant 0 : i32
    return %c0_i32, %c0_i32_0 : i32, i32
  }
  func.func @transform_5(%arg0: i32) -> (i32, i32) {
    %c0_i32 = arith.constant 0 : i32
    %c0_i32_0 = arith.constant 0 : i32
    return %arg0, %c0_i32 : i32, i32
  }
}

</mosaic_0001>

<bundles_post_ra>
// kernel: tpu_custom_call.1
= control target key start
LH: loop header
LB: loop body
LE: loop exit
PB: predicated region body
PF: predicated region fallthrough
CT: control target
= control target key end

     0   :  { %v346_v3 = vmov 0.0|0.0   ;;  %vm347_vm0 = vmmov 0   ;;  %v348_v6 = vmov 0.0   ;;  %s459_s0 = inlined_call_operand.vmem [shape: f32[8,128], index: 0, kind: input, shape index: {}]   ;;  %s460_s1 = inlined_call_operand.vmem [shape: f32[128,24], index: 1, kind: input, shape index: {}]   ;;  %s461_s2 = inlined_call_operand.vmem [shape: f32[1,24], index: 2, kind: input, shape index: {}]   ;;  %s462_s3 = inlined_call_operand.vmem [shape: f32[24,8], index: 3, kind: input, shape index: {}]   ;;  %s463_s4 = inlined_call_operand.vmem [shape: f32[1,8], index: 4, kind: input, shape index: {}]   ;;  %s464_s5 = inlined_call_operand.hbm [shape: f32[8,32], index: 5, kind: output, shape index: {}]  }
   0x1   :  { %v23_v0 = vld [vmem:[%s460_s1] sm:$0xff]  ;;  %v24_v1 = vld [vmem:[%s460_s1 + $0x8] sm:$0xff]  ;;  %v25_v2 = vld [vmem:[%s460_s1 + $0x10] sm:$0xff]  ;;  %290 = vmatprep.subr.bf16.mxu0 %v346_v3  ;;  %278 = vmatprep.mubr.msk.f32.mxu0 %vm347_vm0, %v348_v6 }
   0x2   :  { %v291_v4 = vpack.c.bf16 %v24_v1, %v23_v0  ;;  %v26_v5 = vld [vmem:[%s460_s1 + $0x18] sm:$0xff]  ;;  %314 = vmatprep.subr.bf16.mxu1 %v346_v3  ;;  %287 = vmatprep.mubr.msk.f32.mxu1 %vm347_vm0, %v348_v6  ;;  %v27_v8 = vld [vmem:[%s460_s1 + $0x20] sm:$0xff]  ;;  %v28_v9 = vld [vmem:[%s460_s1 + $0x28] sm:$0xff] }
   0x3   :  { %v294_v7 = vpack.c.bf16 %v26_v5, %v25_v2 }
   0x4   :  { %292 = vmatpush3.bf16.msra.mxu0 %v291_v4 }
   0x5   :  { %293 = vmatprep.subr.bf16.mxu0 %v346_v3 }
   0x6   :  { %10 = vsyncpa [#allocation3], 0  ;;  %v297_v10 = vpack.c.bf16 %v28_v9, %v27_v8  ;;  %v29_v11 = vld [vmem:[%s460_s1 + $0x30] sm:$0xff]  ;;  %v30_v12 = vld [vmem:[%s460_s1 + $0x38] sm:$0xff]  ;;  %vm127_vm1 = vcmask 195584   ;;  %s349_s10 = smov 24  }
   0x7   :  { %v300_v13 = vpack.c.bf16 %v30_v12, %v29_v11  ;;  %v31_v14 = vld [vmem:[%s460_s1 + $0x40] sm:$0xff]  ;;  %v32_v15 = vld [vmem:[%s460_s1 + $0x48] sm:$0xff]  ;;  %v33_v17 = vld [vmem:[%s460_s1 + $0x50] sm:$0xff]  ;;  %vm206_vm2 = vcmask 261120  }
   0x8   :  { %295 = vmatpush3.bf16.msra.mxu0 %v294_v7  ;;  %v303_v16 = vpack.c.bf16 %v32_v15, %v31_v14  ;;  %v34_v18 = vld [vmem:[%s460_s1 + $0x58] sm:$0xff]  ;;  %v35_v20 = vld [vmem:[%s460_s1 + $0x60] sm:$0xff]  ;;  %v36_v21 = vld [vmem:[%s460_s1 + $0x68] sm:$0xff] }
   0x9   :  { %296 = vmatprep.subr.bf16.mxu0 %v346_v3  ;;  %v306_v19 = vpack.c.bf16 %v34_v18, %v33_v17  ;;  %v309_v22 = vpack.c.bf16 %v36_v21, %v35_v20  ;;  %v37_v23 = vld [vmem:[%s460_s1 + $0x70] sm:$0xff]  ;;  %v38_v24 = vld [vmem:[%s460_s1 + $0x78] sm:$0xff]  ;;  %v21_v26 = vld [vmem:[%s459_s0] sm:$0xff] }
   0xa   :  { %v312_v25 = vpack.c.bf16 %v38_v24, %v37_v23  ;;  %v22_v27 = vmax.f32 %v21_v26, 0.0  ;;  %v117_v28 = vld [vmem:[%s462_s3] sm:$0xff]  ;;  %v118_v29 = vld [vmem:[%s462_s3 + $0x8] sm:$0xff]  ;;  %v119_v31 = vld [vmem:[%s462_s3 + $0x10] sm:$0xff]  ;;  %s350_s3 = smov [#allocation2]  }
   0xb   :  { %v315_v30 = vpack.c.bf16 %v118_v29, %v117_v28  ;;  %v222_v32 = vld [vmem:[%s461_s2] ss:$0 sm:$0xff]  ;;  %s214_s11 = sshll.u32 %s350_s3, 4  ;;  %s215_s11 = int_to_ptr.vmem [resolvable:$true] %s214_s11 }
   0xc   :  { %298 = vmatpush3.bf16.msra.mxu0 %v297_v10  ;;  %v223_v37 = vld [vmem:[%s463_s4] ss:$0 sm:$0xff]  ;;  %s322_s2 = scalar_lea.vmem %s215_s11, 128  ;;  %p327_p1 = scmp.lt.s32.totalorder %s215_s11, %s215_s11 }
   0xd   :  { %299 = vmatprep.subr.bf16.mxu0 %v346_v3  ;;  %316 = vmatpush3.bf16.msra.mxu1 %v315_v30  ;;  %p323_p0 = scmp.ne.s32.totalorder %s215_s11, %s322_s2  ;;  %p328_p2 = scmp.lt.s32.totalorder %s322_s2, %s322_s2 }
   0xe   :  { %285 = vmatprep.subr.mxu1 %v348_v6 }
   0xf   :  { %p329_p3 = por %p328_p2, %p327_p1 }
  0x10   :  { %301 = vmatpush3.bf16.msra.mxu0 %v300_v13 }
  0x11   :  { %302 = vmatprep.subr.bf16.mxu0 %v346_v3  ;;  %286 = vmatpush3.msra.mxu1 %v119_v31  ;;  %p330_p4 = pnand %p329_p3, %p323_p0 }
  0x14   :  { %304 = vmatpush3.bf16.msra.mxu0 %v303_v16 }
  0x15   :  { %305 = vmatprep.subr.bf16.mxu0 %v346_v3 }
  0x18   :  { %307 = vmatpush3.bf16.msra.mxu0 %v306_v19 }
  0x19   :  { %308 = vmatprep.subr.bf16.mxu0 %v346_v3 }
  0x1c   :  { %310 = vmatpush3.bf16.msra.mxu0 %v309_v22 }
  0x1d   :  { %311 = vmatprep.subr.bf16.mxu0 %v346_v3 }
  0x20   :  { %313 = vmatpush3.bf16.msra.mxu0 %v312_v25 }
  0x23   :  { %279 = vmatmul.mubr.f32.vlgmr.msra.gmra.mrb[0].mxu0 %v22_v27 }
  0xf6   :  { %v112_v33 = vpop.f32.mrb[0].mxu0 }
  0xf7   :  { %v113_v34 = vadd.f32 %v222_v32, %v112_v33  ;;  %v280_v35 = vpop.f32.mrb[1].mxu0 }
  0xf9   :  { %v116_v36 = vmax.f32 %v113_v34, 0.0 }
  0xfb   :  { %288 = vmatmul.mubr.msk.f32.vlgmr.msra.gmra.mrb[0].mxu1 %vm127_vm1, %v116_v36 }
 0x1ce   :  { %v197_v38 = vpop.f32.mrb[0].mxu1 }
 0x1cf   :  { %v198_v39 = vadd.f32 %v223_v37, %v197_v38  ;;  %v289_v40 = vpop.f32.mrb[1].mxu1 }
 0x1d1   :  { %202 = vrot.lane.b32.xlu0 %v198_v39, %s349_s10 }
 0x243   :  { %v203_v41 = vpop.permute.xlu0 %202 }
 0x244   :  { %v205_v42 = vsel %vm127_vm1, %v113_v34, %v203_v41 }
 0x245   :  { %207 = vst.msk [vmem:[#allocation2] sm:$0xff] %vm206_vm2, %v205_v42 }
 0x246   :  { %333 = shalt.err (!%p330_p4)
}
 0x247   :  { %s334_s13 = scalar_lea.hbm %s464_s5, 128 }
 0x248   :  { %p335_p5 = scmp.ne.s32.totalorder %s464_s5, %s334_s13  ;;  %p338_p6 = scmp.lt.u32.totalorder %s334_s13, %s464_s5 }
 0x24a   :  { %p340_p7 = pnand %p338_p6, %p335_p5 }
 0x24c   :  { %343 = shalt.err (!%p340_p7)
}
 0x24d   :  { %217 = dma.vmem_to_hbm [thread:$0]  %s215_s11, 128, %s464_s5, [#allocation3]  }
 0x24e   :  { %344 = dma.done.wait [#allocation3], 128  }
 0x24f   :  { %345 = vsyncadd [#allocation3], 4294967168 }
 0x250   :  { %221 = vsyncpa [#allocation3], 1 }

</bundles_post_ra>
